<compile_context>
chip_gen: v6e
topology: v6e:2x2x1
jax: 0.10.0
libtpu: 0.0.40
codegen_flags: <defaults>
</compile_context>

<pallas_src>
import jax
import jax.numpy as jnp
from jax.experimental import pallas as pl
from jax.experimental.pallas import tpu as pltpu


_FASTPATH_MAX_BATCH = 65536  # below this, plain XLA fusion beats a kernel launch


def simple_nn_kernel(params_ref, x_ref, o_ref):
    # params (SMEM, f32[9]):
    #   [0:4] = W1 row-major, PyTorch (out, in): w1_00 w1_01 w1_10 w1_11
    #   [4:6] = b1
    #   [6:8] = W2 (1, 2): w2_00 w2_01
    #   [8]   = b2
    # x_ref: (2, tr, L) feature-major; each feature plane is a dense (tr, L)
    # tile -> full 8x128 vregs on both sublanes and lanes.
    x0 = x_ref[0].astype(jnp.float32)   # (tr, L) feature 0 for tr*L batch elems
    x1 = x_ref[1].astype(jnp.float32)   # (tr, L) feature 1

    w1_00 = params_ref[0]
    w1_01 = params_ref[1]
    w1_10 = params_ref[2]
    w1_11 = params_ref[3]
    b1_0 = params_ref[4]
    b1_1 = params_ref[5]
    w2_00 = params_ref[6]
    w2_01 = params_ref[7]
    b2_0 = params_ref[8]

    # fc1 + relu: K=2 contraction unrolled into pure VPU multiply-adds.
    h0 = jnp.maximum(x0 * w1_00 + x1 * w1_01 + b1_0, 0.0)   # (tr, L)
    h1 = jnp.maximum(x0 * w1_10 + x1 * w1_11 + b1_1, 0.0)   # (tr, L)

    # fc2: dense (tr, L) result -> unmasked full-width stores.
    y = h0 * w2_00 + h1 * w2_01 + b2_0
    o_ref[...] = y.astype(o_ref.dtype)


def _round_up(n, m):
    return ((n + m - 1) // m) * m


def simple_nn_reference(x, w1, b1, w2, b2):
    """Plain-JAX reference / small-batch fast path. x: (B, 2) -> (B, 1)."""
    h = jnp.maximum(x @ w1.T + b1[None, :], 0.0)
    return h @ w2.T + b2[None, :]


def simple_nn_forward_fm(x_fm, w1, b1, w2, b2, *, lanes=512, rows_per_tile=None,
                         use_kernel=None):
    """Feature-major entry point (no wrapper transpose).

    x_fm: (2, B) -- row 0 is feature 0 over the batch, row 1 is feature 1.
    Returns (B, 1).
    """
    assert x_fm.ndim == 2 and x_fm.shape[0] == 2, x_fm.shape
    B = x_fm.shape[1]

    if use_kernel is None:
        use_kernel = B >= _FASTPATH_MAX_BATCH
    if not use_kernel:
        # Tiny batches: the op is pure launch/DMA overhead; let XLA fuse it.
        return simple_nn_reference(jnp.transpose(x_fm), w1, b1, w2, b2)

    assert lanes % 128 == 0, "lane tile width must be a multiple of 128"
    L = lanes

    # Pad only when B is not already lane-aligned (static check -> usually a no-op).
    Bp = _round_up(B, L)
    if Bp != B:
        x_fm = jnp.pad(x_fm, ((0, 0), (0, Bp - B)))
    R = Bp // L
    x3 = x_fm.reshape(2, R, L)   # free reshape: contiguous row-major, no data movement

    # Rows-per-tile: big enough to amortize per-step overhead (~0.5M elems/tile
    # at the defaults), >= 2 tiles when possible so v7x's 2 TCs both get work.
    if rows_per_tile is None:
        if R <= 8:
            tr = R
        else:
            tr = max(8, min(1024, (R // 2) // 8 * 8))
    else:
        tr = rows_per_tile
        assert tr == R or tr % 8 == 0, "rows_per_tile must be a multiple of 8"
    grid = (pl.cdiv(R, tr),)   # partial last block handled by clipped writes

    params = jnp.concatenate(
        [w1.reshape(-1), b1.reshape(-1), w2.reshape(-1), b2.reshape(-1)]
    ).astype(jnp.float32)       # f32[9] -> SMEM

    # Explicit VMEM budget: 2 buffers x (input tile + output tile) + margin,
    # capped at 48 MiB so it is safe on v7x (64 MiB physical per TensorCore).
    esize = jnp.dtype(x_fm.dtype).itemsize
    in_tile_bytes = 2 * tr * L * esize
    out_tile_bytes = tr * L * esize
    vmem_limit = int(min(max(2 * (in_tile_bytes + out_tile_bytes) + (4 << 20),
                             32 << 20),
                         48 << 20))

    # Memory-bound hint for the XLA scheduler: ~12 B and ~14 VPU flops per elem.
    cost = pl.CostEstimate(flops=14 * B, transcendentals=0,
                           bytes_accessed=3 * B * esize + 9 * 4)

    out3 = pl.pallas_call(
        simple_nn_kernel,
        out_shape=jax.ShapeDtypeStruct((R, L), x_fm.dtype),
        grid=grid,
        in_specs=[
            # 9 scalar parameters live in SMEM, shared across all grid steps.
            pl.BlockSpec(memory_space=pltpu.MemorySpace.SMEM),
            # Feature-major activations: dense (2, tr, L) tile.
            pl.BlockSpec((2, tr, L), lambda i: (0, i, 0)),
        ],
        out_specs=pl.BlockSpec((tr, L), lambda i: (i, 0)),
        compiler_params=pltpu.CompilerParams(
            dimension_semantics=("parallel",),   # batch tiles split across TCs on v7x
            vmem_limit_bytes=vmem_limit,
        ),
        cost_estimate=cost,
    )(params, x3)

    # Back to (B, 1); padded-tail garbage (if any) is sliced away here.
    return out3.reshape(Bp)[:B][:, None]


def simple_nn_forward(x, w1, b1, w2, b2, *, lanes=512, rows_per_tile=None,
                      use_kernel=None):
    """PyTorch-layout entry point. x: (B, 2) row-major. Returns (B, 1).

    NOTE: the (B,2)->(2,B) transpose below is a full extra HBM read+write of x.
    For peak throughput, produce feature-major activations upstream and call
    simple_nn_forward_fm directly.
    """
    B = x.shape[0]
    if use_kernel is None:
        use_kernel = B >= _FASTPATH_MAX_BATCH
    if not use_kernel:
        return simple_nn_reference(x, w1, b1, w2, b2)
    return simple_nn_forward_fm(jnp.transpose(x), w1, b1, w2, b2,
                                lanes=lanes, rows_per_tile=rows_per_tile,
                                use_kernel=True)


def init_params(key):
    # Deterministic init mimicking nn.Linear default U(-1/sqrt(fan_in), +...).
    k1, k2, k3, k4 = jax.random.split(key, 4)
    bound = 1.0 / jnp.sqrt(2.0)   # fan_in = 2 for both layers
    w1 = jax.random.uniform(k1, (2, 2), jnp.float32, -bound, bound)  # (out=2, in=2)
    b1 = jax.random.uniform(k2, (2,), jnp.float32, -bound, bound)
    w2 = jax.random.uniform(k3, (1, 2), jnp.float32, -bound, bound)  # (out=1, in=2)
    b2 = jax.random.uniform(k4, (1,), jnp.float32, -bound, bound)
    return w1, b1, w2, b2


if __name__ == "__main__":
    key = jax.random.PRNGKey(0)
    kp, kx1, kx2, kx3 = jax.random.split(key, 4)
    w1, b1, w2, b2 = init_params(kp)

    # Case A: module-sized input (torch.randn(1, 2)) -> small-batch fast path.
    x_tiny = jax.random.normal(kx1, (1, 2), jnp.float32)
    y_tiny = jax.block_until_ready(simple_nn_forward(x_tiny, w1, b1, w2, b2))
    assert y_tiny.shape == (1, 1), y_tiny.shape
    assert jnp.allclose(y_tiny, simple_nn_reference(x_tiny, w1, b1, w2, b2),
                        atol=1e-5, rtol=1e-5)

    # Case B: feature-major producer (no wrapper transpose), multi-tile grid.
    # Small lane width here just to exercise a 2-step "parallel" grid at small B.
    B1 = 4096
    x_fm = jax.random.normal(kx2, (2, B1), jnp.float32)
    y1 = jax.block_until_ready(
        simple_nn_forward_fm(x_fm, w1, b1, w2, b2, lanes=128, use_kernel=True))
    ref1 = simple_nn_reference(jnp.transpose(x_fm), w1, b1, w2, b2)
    assert y1.shape == (B1, 1), y1.shape
    assert jnp.allclose(y1, ref1, atol=1e-5, rtol=1e-5)

    # Case C: (B, 2) PyTorch-layout wrapper, odd batch -> conditional pad,
    # partial last row-block (clipped writes) and tail slice.
    B2 = 1900
    x_rm = jax.random.normal(kx3, (B2, 2), jnp.float32)
    y2 = jax.block_until_ready(
        simple_nn_forward(x_rm, w1, b1, w2, b2, lanes=128, use_kernel=True))
    ref2 = simple_nn_reference(x_rm, w1, b1, w2, b2)
    assert y2.shape == (B2, 1), y2.shape
    assert jnp.allclose(y2, ref2, atol=1e-5, rtol=1e-5)

    print("KERNEL_OK")
</pallas_src>

<mosaic_0001>
module attributes {stable_mosaic.version = 11 : i64} {
  func.func @simple_nn_kernel(%arg0: i32, %arg1: memref<9xf32, #tpu.memory_space<smem>>, %arg2: memref<2x16x128xf32, #tpu.memory_space<vmem>>, %arg3: memref<16x128xf32, #tpu.memory_space<vmem>>) attributes {dimension_semantics = [#tpu.dimension_semantics<parallel>], iteration_bounds = array<i64: 2>, scalar_prefetch = 0 : i64, scratch_operands = 0 : i64, tpu.core_type = #tpu.core_type<tc>, window_params = [{transform_indices = @transform_0, window_bounds = array<i64: 9>}, {transform_indices = @transform_1, window_bounds = array<i64: 2, 16, 128>}, {transform_indices = @transform_2, window_bounds = array<i64: 16, 128>}]} {
    %c0 = arith.constant 0 : index
    %c0_0 = arith.constant 0 : index
    %c0_1 = arith.constant 0 : index
    %0 = vector.load %arg2[%c0, %c0_0, %c0_1] : memref<2x16x128xf32, #tpu.memory_space<vmem>>, vector<1x16x128xf32>
    %1 = vector.shape_cast %0 : vector<1x16x128xf32> to vector<16x128xf32>
    %c1 = arith.constant 1 : index
    %c0_2 = arith.constant 0 : index
    %c0_3 = arith.constant 0 : index
    %2 = vector.load %arg2[%c1, %c0_2, %c0_3] : memref<2x16x128xf32, #tpu.memory_space<vmem>>, vector<1x16x128xf32>
    %3 = vector.shape_cast %2 : vector<1x16x128xf32> to vector<16x128xf32>
    %c0_4 = arith.constant 0 : index
    %4 = memref.load %arg1[%c0_4] : memref<9xf32, #tpu.memory_space<smem>>
    %c1_5 = arith.constant 1 : index
    %5 = memref.load %arg1[%c1_5] : memref<9xf32, #tpu.memory_space<smem>>
    %c2 = arith.constant 2 : index
    %6 = memref.load %arg1[%c2] : memref<9xf32, #tpu.memory_space<smem>>
    %c3 = arith.constant 3 : index
    %7 = memref.load %arg1[%c3] : memref<9xf32, #tpu.memory_space<smem>>
    %c4 = arith.constant 4 : index
    %8 = memref.load %arg1[%c4] : memref<9xf32, #tpu.memory_space<smem>>
    %c5 = arith.constant 5 : index
    %9 = memref.load %arg1[%c5] : memref<9xf32, #tpu.memory_space<smem>>
    %c6 = arith.constant 6 : index
    %10 = memref.load %arg1[%c6] : memref<9xf32, #tpu.memory_space<smem>>
    %c7 = arith.constant 7 : index
    %11 = memref.load %arg1[%c7] : memref<9xf32, #tpu.memory_space<smem>>
    %c8 = arith.constant 8 : index
    %12 = memref.load %arg1[%c8] : memref<9xf32, #tpu.memory_space<smem>>
    %13 = vector.broadcast %4 : f32 to vector<16x128xf32>
    %14 = arith.mulf %1, %13 : vector<16x128xf32>
    %15 = vector.broadcast %5 : f32 to vector<16x128xf32>
    %16 = arith.mulf %3, %15 : vector<16x128xf32>
    %17 = arith.addf %14, %16 : vector<16x128xf32>
    %18 = vector.broadcast %8 : f32 to vector<16x128xf32>
    %19 = arith.addf %17, %18 : vector<16x128xf32>
    %cst = arith.constant 0.000000e+00 : f32
    %20 = vector.broadcast %cst : f32 to vector<16x128xf32>
    %21 = arith.maximumf %19, %20 : vector<16x128xf32>
    %22 = vector.broadcast %6 : f32 to vector<16x128xf32>
    %23 = arith.mulf %1, %22 : vector<16x128xf32>
    %24 = vector.broadcast %7 : f32 to vector<16x128xf32>
    %25 = arith.mulf %3, %24 : vector<16x128xf32>
    %26 = arith.addf %23, %25 : vector<16x128xf32>
    %27 = vector.broadcast %9 : f32 to vector<16x128xf32>
    %28 = arith.addf %26, %27 : vector<16x128xf32>
    %cst_6 = arith.constant 0.000000e+00 : f32
    %29 = vector.broadcast %cst_6 : f32 to vector<16x128xf32>
    %30 = arith.maximumf %28, %29 : vector<16x128xf32>
    %31 = vector.broadcast %10 : f32 to vector<16x128xf32>
    %32 = arith.mulf %21, %31 : vector<16x128xf32>
    %33 = vector.broadcast %11 : f32 to vector<16x128xf32>
    %34 = arith.mulf %30, %33 : vector<16x128xf32>
    %35 = arith.addf %32, %34 : vector<16x128xf32>
    %36 = vector.broadcast %12 : f32 to vector<16x128xf32>
    %37 = arith.addf %35, %36 : vector<16x128xf32>
    %c0_7 = arith.constant 0 : index
    %c0_8 = arith.constant 0 : index
    %38 = vector.load %arg3[%c0_7, %c0_8] : memref<16x128xf32, #tpu.memory_space<vmem>>, vector<16x128xf32>
    tpu.vector_store %arg3[%c0_7, %c0_8], %37 {strides = array<i32>} : memref<16x128xf32, #tpu.memory_space<vmem>>, vector<16x128xf32>,
    return
  }
  func.func @transform_0(%arg0: i32) -> i32 {
    %c0_i32 = arith.constant 0 : i32
    %c0_i32_0 = arith.constant 0 : i32
    return %c0_i32 : i32
  }
  func.func @transform_1(%arg0: i32) -> (i32, i32, i32) {
    %c0_i32 = arith.constant 0 : i32
    %c0_i32_0 = arith.constant 0 : i32
    %c0_i32_1 = arith.constant 0 : i32
    return %c0_i32, %arg0, %c0_i32_0 : i32, i32, i32
  }
  func.func @transform_2(%arg0: i32) -> (i32, i32) {
    %c0_i32 = arith.constant 0 : i32
    %c0_i32_0 = arith.constant 0 : i32
    return %arg0, %c0_i32 : i32, i32
  }
}

</mosaic_0001>

<bundles_post_ra>
// kernel: tpu_custom_call.1
= control target key start
LH: loop header
LB: loop body
LE: loop exit
PB: predicated region body
PF: predicated region fallthrough
CT: control target
= control target key end

     0   :  { %7 = vsyncpa [#allocation5], 0  ;;  %s728_s0 = inlined_call_operand.hbm [shape: f32[9], index: 0, kind: input, shape index: {}]   ;;  %s729_s1 = inlined_call_operand.hbm [shape: f32[2,32,128], index: 1, kind: input, shape index: {}]   ;;  %s730_s2 = inlined_call_operand.hbm [shape: f32[32,128], index: 2, kind: output, shape index: {}]  }
   0x1   :  { %8 = vsyncpa [#allocation3], 0 }
   0x2   :  { %10 = vsyncpa [#allocation3 + $0x1], 0 }
   0x3   :  { %11 = vsyncpa [#allocation4], 0 }
   0x4   :  { %13 = vsyncpa [#allocation4 + $0x1], 0  ;;  %s556_s9 = smov 0   ;;  %s558_s10 = smov 0  }
   0x5   :  { %s560_s11 = smov 0   ;;  %s562_s12 = smov 0  }
   0x6 LB: > { %s577_s13 = sadd.s32 4294967295, %s529_s12   ;;  %s353_s14 = sadd.s32 4294967294, %s529_s12   ;;  %s529_s12 = sphi %s562_s12, %s739_s12   ;;  %s525_s11 = sphi %s560_s11, %s738_s11   ;;  %s521_s10 = sphi %s558_s10, %s737_s10   ;;  %s517_s9 = sphi %s556_s9, %s736_s9  }
   0x7   : > { %s581_s15 = sadd.s32 1, %s529_s12   ;;  %s47_s16 = sadd.s32 1, %s525_s11 }
   0x8   : > { %s44_s17 = ssub.s32 %s529_s12, %s581_s15  ;;  %p54_p0 = scmp.ne.s32.totalorder %s525_s11, %s521_s10 }
   0x9   : > { %p45_p1 = scmp.eq.s32.totalorder %s44_s17, 0  ;;  %p55_p2 = scmp.eq.s32.totalorder %s529_s12, 0 }
   0xa   : > { %p60_p3 = scmp.ne.s32.totalorder %s521_s10, %s517_s9  ;;  %p61_p4 = scmp.eq.s32.totalorder %s577_s13, 0 }
   0xb   : > { %s593_s18 = scalar_select %p45_p1, %s525_s11, %s47_s16  }
   0xc   : > { %p595_p5 = por %p55_p2, %p54_p0  ;;  %p601_p6 = por %p61_p4, %p60_p3 }
   0xd   : > { %p84_p7 = scmp.eq.s32.totalorder %s577_s13, 1  ;;  %p90_p8 = scmp.eq.s32.totalorder %s353_s14, 1 }
   0xe   : > { %p354_p9 = scmp.ge.s32.totalorder %s529_s12, 1  ;;  %p97_p10 = scmp.lt.s32.totalorder %s529_s12, 3 }
   0xf   : > { %p608_p11 = por %p84_p7, %p54_p0  ;;  %p612_p12 = por %p90_p8, %p60_p3 }
  0x10   : > { %p616_p13 = pnand %p354_p9, %p97_p10  ;;  %s531_s24 = smov [#allocation2]  }
  0x11   : > { %p356_p0 = scmp.ge.s32.totalorder %s529_s12, 2 }
  0x12   : > { %p398_p1 = pneg %p616_p13 }
  0x13   : > { %115 = sbr.rel (%p356_p0) target bundleno = 37 (0x25), region = 20 }
  0x14   : > { %p399_p2 = pnand %p398_p1, %p61_p4 }
  0x16   : > { %401 = dma.hbm_to_smem (!%p399_p2), %s728_s0, 16, %s531_s24, [#allocation5]  }
  0x18   : > { %s119_s27 = sand.u32 1, %s525_s11   ;;  %s381_s28 = sshll.u32 %s529_s12, 8 }
  0x19   : > { %s357_s29 = sshll.u32 %s119_s27, 5  ;;  %s129_s4 = scalar_lea.hbm %s729_s1, %s381_s28 }
  0x1a   : > { %s385_s5 = scalar_select %p595_p5, [#allocation0], [#allocation10] }
  0x1b   : > { %s123_s6 = scalar_lea.vmem [#allocation6], %s357_s29  ;;  %s532_s14 = smov 512  }
  0x1c   : > { %s142_s7 = sshll.u32 %s123_s6, 4  ;;  %s134_s8 = sld [smem:[%s385_s5]]   ;;  %s143_s7 = int_to_ptr.vmem [resolvable:$true] %s142_s7 }
  0x1d   : > { %386 = sst [smem:[#allocation9]] (%p595_p5), %s532_s14  ;;  %s533_s16 = smov 256  }
  0x1e   : > { %387 = sst [smem:[#allocation9 + $0x1]] (%p595_p5), %s533_s16  ;;  %s534_s17 = smov 2  }
  0x1f   : > { %388 = sst [smem:[#allocation9 + $0x2]] (%p595_p5), %s534_s17  ;;  %s535_s24 = smov 128  }
  0x20   : > { %389 = sst [smem:[#allocation9 + $0x3]] (%p595_p5), %s535_s24  ;;  %s536_s26 = smov 8  }
  0x21   : > { %390 = sst [smem:[#allocation9 + $0x4]] (%p595_p5), %s535_s24  ;;  %s120_s29 = scalar_lea.sflag [#allocation3], %s119_s27 }
  0x22   : > { %s360_s25 = sshll.u32 %s134_s8, 26  ;;  %391 = sst [smem:[#allocation9 + $0x5]] (%p595_p5), %s536_s26 }
  0x23   : > { %s361_s28 = sadd.s32 134217728, %s360_s25  ;;  %s537_s30 = smov 131072  }
  0x24   : > { %392 = dma.general (%p595_p5), %s129_s4, 512, %s143_s7, %s120_s29, %s537_s30, [#allocation9], %s361_s28, 0  }
  0x25 PF: > { %167 = sbr.rel (%p616_p13) target bundleno = 88 (0x58), region = 28 }
  0x2a   : > { %504 = dma.done.wait (%p61_p4), [#allocation5], 16  }
  0x2b   : > { %506 = vsyncadd (%p61_p4), [#allocation5], 4294967280  ;;  %s658_s3 = sand.u32 1, %s521_s10  }
  0x2c   : > { %s364_s27 = sshll.u32 %s658_s3, 5  ;;  %s174_s5 = scalar_lea.sflag [#allocation3], %s658_s3 }
  0x2d   : > { %s177_s19 = scalar_lea.vmem [#allocation6], %s364_s27 }
  0x2e   : > { %508 = dma.done.wait (%p601_p6), %s174_s5, 512  }
  0x2f   : > { %510 = vsyncadd (%p601_p6), %s174_s5, 4294966784 }
  0x30   : > { %182 = sfence }
  0x31   : > { %s206_s23 = sld [smem:[#allocation2]]  ;;  %v201_v0 = vld [vmem:[%s177_s19] sm:$0xff]  ;;  %v202_v1 = vld [vmem:[%s177_s19 + $0x8] sm:$0xff]  ;;  %v366_v2 = vld [vmem:[%s177_s19 + $0x10] sm:$0xff]  ;;  %s365_s24 = sshll.u32 %s658_s3, 4 }
  0x32   : > { %s368_s4 = sld [smem:[#allocation2 + $0x1]]  ;;  %v367_v3 = vld [vmem:[%s177_s19 + $0x18] sm:$0xff]  ;;  %s198_s25 = scalar_lea.vmem [#allocation7], %s365_s24 }
  0x33   : > { %s369_s6 = sld [smem:[#allocation2 + $0x2]]  ;;  %s268_s26 = sshll.u32 %s198_s25, 4  ;;  %s680_s26 = int_to_ptr.vmem [resolvable:$true] %s268_s26 }
  0x34   : > { %s370_s7 = sld [smem:[#allocation2 + $0x3]]  ;;  %s382_s28 = sshll.u32 %s577_s13, 8 }
  0x35   : > { %s371_s8 = sld [smem:[#allocation2 + $0x4]]  ;;  %s685_s27 = scalar_lea.hbm %s730_s2, %s382_s28 }
  0x36   : > { %s666_s14 = sld [smem:[#allocation2 + $0x5]]  ;;  %s255_s5 = scalar_lea.sflag [#allocation4], %s658_s3 }
  0x37   : > { %s668_s16 = sld [smem:[#allocation2 + $0x6]]  ;;  %v215_v4 = vstv %s206_s23  ;;  %s461_s19 = scalar_lea.vmem %s680_s26, 256 }
  0x38   : > { %s670_s17 = sld [smem:[#allocation2 + $0x7]]  ;;  %v216_v5 = vmul.f32 %v215_v4, %v201_v0  ;;  %v218_v6 = vstv %s368_s4  ;;  %v217_v7 = vmul.f32 %v215_v4, %v202_v1  ;;  %p462_p3 = scmp.ne.s32.totalorder %s680_s26, %s461_s19 }
  0x39   : > { %v219_v8 = vmul.f32 %v366_v2, %v218_v6  ;;  %v228_v9 = vstv %s369_s6  ;;  %v220_v10 = vmul.f32 %v367_v3, %v218_v6  ;;  %s672_s20 = sld [smem:[#allocation2 + $0x8]]  ;;  %s538_s13 = smov [#allocation7]  }
  0x3a   : > { %v229_v11 = vmul.f32 %v228_v9, %v201_v0  ;;  %v231_v12 = vstv %s370_s7  ;;  %v230_v13 = vmul.f32 %v228_v9, %v202_v1  ;;  %p463_p4 = pnand %p462_p3, %p608_p11  ;;  %s465_s23 = sshll.u32 %s538_s13, 4  ;;  %s466_s23 = int_to_ptr.vmem [resolvable:$false] %s465_s23 }
  0x3b   : > { %v221_v14 = vadd.f32 %v219_v8, %v216_v5  ;;  %v223_v15 = vstv %s371_s8  ;;  %v232_v16 = vmul.f32 %v366_v2, %v231_v12  ;;  %v222_v17 = vadd.f32 %v220_v10, %v217_v7  ;;  %s467_s4 = scalar_lea.vmem %s466_s23, 512  ;;  %p468_p6 = scmp.lt.s32.totalorder %s680_s26, %s466_s23 }
  0x3c   : > { %v236_v18 = vstv %s666_s14  ;;  %v233_v19 = vmul.f32 %v367_v3, %v231_v12  ;;  %p464_p5 = pneg %p463_p4  ;;  %p469_p7 = scmp.lt.s32.totalorder %s467_s4, %s461_s19 }
  0x3d   : > { %v224_v20 = vadd.f32 %v223_v15, %v221_v14  ;;  %v234_v21 = vadd.f32 %v232_v16, %v229_v11  ;;  %v225_v22 = vadd.f32 %v223_v15, %v222_v17  ;;  %v241_v23 = vstv %s668_s16 }
  0x3e   : > { %v235_v24 = vadd.f32 %v233_v19, %v230_v13  ;;  %v244_v28 = vstv %s670_s17  ;;  %p470_p8 = por %p469_p7, %p468_p6 }
  0x3f   : > { %v226_v25 = vmax.f32 %v224_v20, 0.0  ;;  %v237_v26 = vadd.f32 %v236_v18, %v234_v21  ;;  %v227_v27 = vmax.f32 %v225_v22, 0.0  ;;  %v249_v35 = vstv %s672_s20 }
  0x40   : > { %v238_v29 = vadd.f32 %v236_v18, %v235_v24  ;;  %p471_p9 = pnand %p470_p8, %p464_p5 }
  0x41   : > { %v239_v30 = vmax.f32 %v237_v26, 0.0  ;;  %v242_v31 = vmul.f32 %v241_v23, %v226_v25  ;;  %v243_v33 = vmul.f32 %v241_v23, %v227_v27 }
  0x42   : > { %v240_v32 = vmax.f32 %v238_v29, 0.0 }
  0x43   : > { %v245_v34 = vmul.f32 %v244_v28, %v239_v30 }
  0x44   : > { %v246_v36 = vmul.f32 %v244_v28, %v240_v32 }
  0x45   : > { %v247_v37 = vadd.f32 %v245_v34, %v242_v31 }
  0x46   : > { %v248_v38 = vadd.f32 %v246_v36, %v243_v33 }
  0x47   : > { %v250_v39 = vadd.f32 %v249_v35, %v247_v37 }
  0x48   : > { %v251_v40 = vadd.f32 %v249_v35, %v248_v38 }
  0x49   : > { %252 = vst [vmem:[%s198_s25] sm:$0xff] %v250_v39 }
  0x4a   : > { %253 = vst [vmem:[%s198_s25 + $0x8] sm:$0xff] %v251_v40 }
  0x4b   : > { %474 = shalt.err (!%p471_p9)
}
  0x4c   : > { %s475_s6 = scalar_lea.hbm %s685_s27, 256  ;;  %s479_s14 = scalar_lea.hbm %s730_s2, 512 }
  0x4d   : > { %p476_p10 = scmp.ne.s32.totalorder %s685_s27, %s475_s6  ;;  %p480_p2 = scmp.lt.s32.totalorder %s685_s27, %s730_s2 }
  0x4e   : > { %p481_p3 = scmp.lt.s32.totalorder %s479_s14, %s475_s6 }
  0x4f   : > { %p477_p13 = pnand %p476_p10, %p608_p11 }
  0x50   : > { %p482_p4 = por %p481_p3, %p480_p2 }
  0x51   : > { %p478_p1 = pneg %p477_p13 }
  0x53   : > { %p483_p5 = pnand %p482_p4, %p478_p1 }
  0x55   : > { %486 = shalt.err (!%p483_p5)
}
  0x56   : > { %s539_s20 = smov 128   ;;  %s540_s24 = smov 8  }
  0x57   : > { %396 = dma.vmem_to_hbm [thread:$0]  (%p608_p11), %s680_s26, 256, %s685_s27, %s255_s5, %s539_s20, %s539_s20, %s540_s24  }
  0x58 PF: > { %s283_s25 = sand.u32 1, %s517_s9   ;;  %p403_p6 = pnand %p356_p0, %p612_p12 }
  0x59   : > { %s284_s28 = scalar_lea.sflag [#allocation4], %s283_s25 }
  0x5a   : > { %p404_p7 = pneg %p403_p6 }
  0x5c   : > { %512 = dma.done.wait (%p404_p7), %s284_s28, 256  }
  0x5d   : > { %514 = vsyncadd (%p404_p7), %s284_s28, 4294967040  ;;  %p16_p8 = scmp.ge.s32.totalorder %s581_s15, 4   ;;  %s736_s9 = smov %s521_s10 }
  0x5e   : > { %s737_s10 = smov %s525_s11  ;;  %s738_s11 = smov %s593_s18 }
  0x5f   : > { %s739_s12 = smov %s581_s15  ;;  %18 = sbr.rel (!%p16_p8) target bundleno = 6 (0x6), region = 84 }
  0x64   :  { %289 = vsyncpa [#allocation3], 1 }
  0x65   :  { %291 = vsyncpa [#allocation3 + $0x1], 1 }
  0x66   :  { %292 = vsyncpa [#allocation4], 1 }
  0x67   :  { %294 = vsyncpa [#allocation4 + $0x1], 1 }
  0x68   :  { %295 = vsyncpa [#allocation5], 1 }
  0x69   :  { %297 = vsyncpa [#allocation5 + $0x1], 1 }

</bundles_post_ra>
